<compile_context>
chip_gen: v6e
topology: v6e:2x2x1
jax: 0.10.0
libtpu: 0.0.40
codegen_flags: <defaults>
</compile_context>

<pallas_src>
import jax
import jax.numpy as jnp
from jax.experimental import pallas as pl
from jax.experimental.pallas import tpu as pltpu


def _linear_sigmoid_kernel(p_ref, x_ref, o_ref):
    # p_ref: (3,)   in SMEM  -> [w0, w1, b]   (flattened nn.Linear(2,1) params)
    # x_ref: (2, N) in VMEM  -> batch on the lane axis (lane-dense)
    # o_ref: (1, N) in VMEM
    w0 = p_ref[0]
    w1 = p_ref[1]
    b = p_ref[2]

    x0 = x_ref[0:1, :]                      # (1, N) full-width lane rows
    x1 = x_ref[1:2, :]                      # (1, N)

    # z = x @ w.T + b  as two VPU multiply-adds (no MXU, no cross-lane reduce)
    z = x0 * w0 + x1 * w1 + b               # (1, N)

    # sigmoid(z) = 0.5 * tanh(0.5 * z) + 0.5  — single EUP op, exact, bounded.
    o_ref[...] = 0.5 * jnp.tanh(0.5 * z) + 0.5


def net_forward(x, w, b):
    """Pallas equivalent of Net.forward.

    x: (N, 2) float32
    w: (1, 2) float32   -- PyTorch nn.Linear weight layout (out, in)
    b: (1,)   float32
    returns: (N, 1) float32
    """
    n = x.shape[0]

    # Flatten parameters into one tiny SMEM-resident vector: [w0, w1, b].
    params = jnp.concatenate([w.reshape(-1), b.reshape(-1)]).astype(jnp.float32)

    # Lane-dense input: batch on the last (lane) axis.
    x_t = x.T  # (2, N)

    out_1n = pl.pallas_call(
        _linear_sigmoid_kernel,
        out_shape=jax.ShapeDtypeStruct((1, n), jnp.float32),
        in_specs=[
            pl.BlockSpec(memory_space=pltpu.MemorySpace.SMEM),   # params (3,)
            pl.BlockSpec(memory_space=pltpu.MemorySpace.VMEM),   # x_t (2, N)
        ],
        out_specs=pl.BlockSpec(memory_space=pltpu.MemorySpace.VMEM),
    )(params, x_t)

    # Back to the PyTorch output layout (N, 1) — free for row-major at this size.
    return out_1n.T


if __name__ == "__main__":
    # Deterministic parameter init, same shapes as nn.Linear(2, 1):
    #   weight: (1, 2), bias: (1,), uniform(-1/sqrt(in), 1/sqrt(in)) like PyTorch.
    key = jax.random.PRNGKey(0)
    kw, kb = jax.random.split(key)
    bound = 1.0 / jnp.sqrt(2.0)
    w = jax.random.uniform(kw, (1, 2), jnp.float32, minval=-bound, maxval=bound)
    b = jax.random.uniform(kb, (1,), jnp.float32, minval=-bound, maxval=bound)

    # The XOR truth-table input from the original script.
    x = jnp.array([[0, 0], [0, 1], [1, 0], [1, 1]], dtype=jnp.float32)

    out = net_forward(x, w, b)
    out = jax.block_until_ready(out)

    # Sanity check against plain-JAX reference (tanh form is exact sigmoid).
    ref = jax.nn.sigmoid(x @ w.T + b)
    assert out.shape == (4, 1), out.shape
    assert jnp.allclose(out, ref, atol=1e-5), (out, ref)
    assert bool(jnp.all(out >= 0.0)) and bool(jnp.all(out <= 1.0))

    print("KERNEL_OK")
</pallas_src>

<mosaic_0001>
module attributes {stable_mosaic.version = 11 : i64} {
  func.func @_linear_sigmoid_kernel(%arg0: memref<3xf32, #tpu.memory_space<smem>>, %arg1: memref<2x4xf32, #tpu.memory_space<vmem>>, %arg2: memref<1x4xf32, #tpu.memory_space<vmem>>) attributes {dimension_semantics = [], scalar_prefetch = 0 : i64, scratch_operands = 0 : i64, tpu.core_type = #tpu.core_type<tc>} {
    %c0 = arith.constant 0 : index
    %0 = memref.load %arg0[%c0] : memref<3xf32, #tpu.memory_space<smem>>
    %c1 = arith.constant 1 : index
    %1 = memref.load %arg0[%c1] : memref<3xf32, #tpu.memory_space<smem>>
    %c2 = arith.constant 2 : index
    %2 = memref.load %arg0[%c2] : memref<3xf32, #tpu.memory_space<smem>>
    %c0_0 = arith.constant 0 : index
    %c0_1 = arith.constant 0 : index
    %3 = vector.load %arg1[%c0_0, %c0_1] : memref<2x4xf32, #tpu.memory_space<vmem>>, vector<1x4xf32>
    %c1_2 = arith.constant 1 : index
    %c0_3 = arith.constant 0 : index
    %4 = vector.load %arg1[%c1_2, %c0_3] : memref<2x4xf32, #tpu.memory_space<vmem>>, vector<1x4xf32>
    %5 = vector.broadcast %0 : f32 to vector<1x4xf32>
    %6 = arith.mulf %3, %5 : vector<1x4xf32>
    %7 = vector.broadcast %1 : f32 to vector<1x4xf32>
    %8 = arith.mulf %4, %7 : vector<1x4xf32>
    %9 = arith.addf %6, %8 : vector<1x4xf32>
    %10 = vector.broadcast %2 : f32 to vector<1x4xf32>
    %11 = arith.addf %9, %10 : vector<1x4xf32>
    %cst = arith.constant 5.000000e-01 : f32
    %12 = vector.broadcast %cst : f32 to vector<1x4xf32>
    %13 = arith.mulf %12, %11 : vector<1x4xf32>
    %14 = math.tanh %13 : vector<1x4xf32>
    %cst_4 = arith.constant 5.000000e-01 : f32
    %15 = vector.broadcast %cst_4 : f32 to vector<1x4xf32>
    %16 = arith.mulf %15, %14 : vector<1x4xf32>
    %cst_5 = arith.constant 5.000000e-01 : f32
    %17 = vector.broadcast %cst_5 : f32 to vector<1x4xf32>
    %18 = arith.addf %16, %17 : vector<1x4xf32>
    %c0_6 = arith.constant 0 : index
    %c0_7 = arith.constant 0 : index
    %19 = vector.load %arg2[%c0_6, %c0_7] : memref<1x4xf32, #tpu.memory_space<vmem>>, vector<1x4xf32>
    tpu.vector_store %arg2[%c0_6, %c0_7], %18 {strides = array<i32>} : memref<1x4xf32, #tpu.memory_space<vmem>>, vector<1x4xf32>,
    return
  }
}

</mosaic_0001>

<bundles_post_ra>
// kernel: tpu_custom_call.1
= control target key start
LH: loop header
LB: loop body
LE: loop exit
PB: predicated region body
PF: predicated region fallthrough
CT: control target
= control target key end

     0   :  { %7 = vsyncpa [#allocation5], 0  ;;  %s157_s0 = inlined_call_operand.hbm [shape: f32[3], index: 0, kind: input, shape index: {}]   ;;  %s158_s1 = inlined_call_operand.hbm [shape: f32[2,4], index: 1, kind: input, shape index: {}]   ;;  %s159_s2 = inlined_call_operand.hbm [shape: f32[1,4], index: 2, kind: output, shape index: {}]  }
   0x1   :  { %8 = vsyncpa [#allocation3], 0 }
   0x2   :  { %9 = vsyncpa [#allocation4], 0  ;;  %s130_s9 = smov [#allocation2]   ;;  %s131_s12 = smov [#allocation6]  }
   0x3   :  { %17 = dma.hbm_to_smem %s157_s0, 16, %s130_s9, [#allocation5]  }
   0x4   :  { %s24_s13 = sshll.u32 %s131_s12, 4  ;;  %s25_s13 = int_to_ptr.vmem [resolvable:$true] %s24_s13 }
   0x5   :  { %s92_s14 = scalar_lea.vmem %s25_s13, 32  ;;  %p97_p1 = scmp.lt.s32.totalorder %s25_s13, %s25_s13 }
   0x6   :  { %p93_p0 = scmp.ne.s32.totalorder %s25_s13, %s92_s14  ;;  %p98_p2 = scmp.lt.s32.totalorder %s92_s14, %s92_s14 }
   0x8   :  { %p99_p3 = por %p98_p2, %p97_p1 }
   0xa   :  { %p100_p4 = pnand %p99_p3, %p93_p0 }
   0xc   :  { %103 = shalt.err (!%p100_p4)
}
   0xd   :  { %27 = dma.hbm_to_vmem [thread:$0]  %s158_s1, 32, %s25_s13, [#allocation3]  }
   0xe   :  { %124 = dma.done.wait [#allocation5], 16  }
   0xf   :  { %125 = vsyncadd [#allocation5], 4294967280 }
  0x10   :  { %126 = dma.done.wait [#allocation3], 32  }
  0x11   :  { %127 = vsyncadd [#allocation3], 4294967264 }
  0x12   :  { %34 = sfence }
  0x13   :  { %s35_s0 = sld [smem:[#allocation2]]  ;;  %v38_v0 = vld [vmem:[#allocation6] sm:$0x1]  ;;  %v39_v1 = vld [vmem:[#allocation6 + $0x1] sm:$0x1]  ;;  %s132_s1 = smov [#allocation7]  }
  0x14   :  { %s69_s17 = sld [smem:[#allocation2 + $0x1]]  ;;  %s59_s19 = sshll.u32 %s132_s1, 4  ;;  %vm51_vm0 = vcmask 24576   ;;  %s60_s19 = int_to_ptr.vmem [resolvable:$true] %s59_s19 }
  0x15   :  { %s70_s18 = sld [smem:[#allocation2 + $0x2]]  ;;  %s104_s20 = scalar_lea.vmem %s60_s19, 16 }
  0x16   :  { %p105_p5 = scmp.ne.s32.totalorder %s60_s19, %s104_s20  ;;  %s108_s21 = scalar_lea.vmem %s60_s19, 32 }
  0x17   :  { %p109_p6 = scmp.lt.s32.totalorder %s60_s19, %s60_s19  ;;  %p110_p7 = scmp.lt.s32.totalorder %s108_s21, %s104_s20 }
  0x19   :  { %v40_v2 = vstv %s35_s0  ;;  %p111_p8 = por %p110_p7, %p109_p6 }
  0x1a   :  { %v41_v3 = vmul.f32 %v40_v2, %v38_v0  ;;  %v42_v4 = vstv %s69_s17 }
  0x1b   :  { %v43_v5 = vmul.f32 %v42_v4, %v39_v1  ;;  %v45_v6 = vstv %s70_s18  ;;  %p112_p9 = pnand %p111_p8, %p105_p5 }
  0x1d   :  { %v44_v7 = vadd.f32 %v43_v5, %v41_v3 }
  0x1f   :  { %v46_v8 = vadd.f32 %v45_v6, %v44_v7 }
  0x21   :  { %v47_v9 = vmul.f32 0.5, %v46_v8 }
  0x23   :  { %74 = vtanh.f32 %v47_v9 }
  0x30   :  { %v75_v10 = vpop.eup %74 }
  0x31   :  { %v49_v11 = vmul.f32 0.5, %v75_v10 }
  0x33   :  { %v50_v12 = vadd.f32 0.5, %v49_v11 }
  0x35   :  { %52 = vst.msk [vmem:[#allocation7] sm:$0x1] %vm51_vm0, %v50_v12 }
  0x36   :  { %115 = shalt.err (!%p112_p9)
}
  0x37   :  { %62 = dma.vmem_to_hbm [thread:$0]  %s60_s19, 16, %s159_s2, [#allocation4]  }
  0x38   :  { %128 = dma.done.wait [#allocation4], 16  }
  0x39   :  { %129 = vsyncadd [#allocation4], 4294967280 }
  0x3a   :  { %66 = vsyncpa [#allocation3], 1 }
  0x3b   :  { %67 = vsyncpa [#allocation4], 1 }
  0x3c   :  { %68 = vsyncpa [#allocation5], 1 }

</bundles_post_ra>
